<compile_context>
chip_gen: v7x
topology: tpu7x:2x2x1
jax: 0.10.0
libtpu: 0.0.40
codegen_flags: <defaults>
</compile_context>

<pallas_src>
import jax
import jax.numpy as jnp
from jax import lax
from jax.experimental import pallas as pl
from jax.experimental.pallas import tpu as pltpu


def _cdiv(a, b):
    return -(-a // b)


def _round_up(a, b):
    return _cdiv(a, b) * b


def _make_sum_kernel_tiled(*, rows, t_rows, L, nt, nt_per, ns):
    """Streaming lane-sum kernel, multi-tile case (t_rows % 8 == 0).

    x_ref: (1, t_rows, L) block of the (B, rows, L) input, raw dtype.
    o_ref: (1, 1, 8, L) f32, resident across the row-tile ("arbitrary") axis.
    """
    has_partial = (rows % t_rows != 0) or (ns * nt_per != nt)
    n8 = t_rows // 8

    def block_sum(x):
        # (t_rows, L) -> (8, L): pure vreg-wise VALU adds (f32 accumulation is
        # fused into the reduce; no widened block-sized temp is requested).
        # The 8 -> 1 cross-sublane fold happens once, in the XLA epilogue.
        return jnp.sum(x.reshape(n8, 8, L), axis=0, dtype=jnp.float32)

    def kernel(x_ref, o_ref):
        s = pl.program_id(1)
        t = pl.program_id(2)

        @pl.when(t == 0)
        def _():
            o_ref[...] = jnp.zeros_like(o_ref)

        start = (s * nt_per + t) * t_rows  # first (unclamped) row of this tile

        if has_partial:
            @pl.when(start + t_rows <= rows)
            def _():
                o_ref[0, 0] += block_sum(x_ref[0])

            @pl.when(start + t_rows > rows)
            def _():
                # Tail / overflow tile: rows past `rows` hold undefined data
                # (there is no wrapper-side padding) -> mask before summing.
                x = x_ref[0]
                valid = rows - start                      # may be <= 0
                ridx = lax.broadcasted_iota(jnp.int32, (t_rows, L), 0)
                xm = jnp.where(ridx < valid, x, jnp.zeros_like(x))
                o_ref[0, 0] += block_sum(xm)
        else:
            o_ref[0, 0] += block_sum(x_ref[0])

    return kernel


def _make_sum_kernel_single(*, L):
    """Single-tile case: the whole per-batch slab fits in one block (its
    sublane extent equals the full dim, so it need not be a multiple of 8)."""

    def kernel(x_ref, o_ref):
        o_ref[0, 0] = jnp.sum(x_ref[0], axis=0, keepdims=True,
                              dtype=jnp.float32)

    return kernel


def ace_loss(x, label, *, target_block_bytes=6 * 1024 * 1024):
    """x: (B, H, W, C) float (any dtype), label: (B, C) float. Scalar loss."""
    B, H, W, C = x.shape
    T = H * W
    itemsize = jnp.dtype(x.dtype).itemsize

    # ---- layout selection: NEVER materializes a padded/sliced copy of x ----
    packed = (C <= 128) and (128 % C == 0) and ((T * C) % 128 == 0)
    if packed:
        L = 128
        rows = (T * C) // 128
        G = L // C                         # interleaved class groups per row
    else:
        # Natural (B, T, C) layout; lanes under-utilized if C % 128 != 0 but
        # HBM reads stay contiguous and 1x.
        L = C
        rows = T
        G = 1
    x_in = x.reshape(B, rows, L)           # contiguous bitcast reshape, no copy

    # ---- row-tile sizing: VMEM budget uses the lane-PADDED width ----
    L_pad = _round_up(L, 128)
    tr_cap = max(8, (target_block_bytes // (L_pad * itemsize)) // 8 * 8)

    if rows <= tr_cap:
        t_rows, nt = rows, 1
    else:
        nt = _cdiv(rows, tr_cap)
        t_rows = _round_up(_cdiv(rows, nt), 8)   # balanced, multiple of 8
        nt = _cdiv(rows, t_rows)

    # ---- v7x: split the row reduction across the 2 TCs when the batch axis
    # alone cannot keep both busy. No-op on single-TC v5e/v6e. ----
    ns = 2 if (B % 2 == 1 and nt >= 2) else 1
    nt_per = _cdiv(nt, ns)

    if nt == 1:
        kernel = _make_sum_kernel_single(L=L)
        out_rows = 1
    else:
        kernel = _make_sum_kernel_tiled(rows=rows, t_rows=t_rows, L=L,
                                        nt=nt, nt_per=nt_per, ns=ns)
        out_rows = 8

    def x_map(b, s, t):
        # Clamp so a possible overflow tile (ns * nt_per > nt) stays in-bounds;
        # its contribution is masked to zero in-kernel.
        return (b, jnp.minimum(s * nt_per + t, nt - 1), 0)

    def o_map(b, s, t):
        return (b, s, 0, 0)

    cost = pl.CostEstimate(
        flops=B * rows * L,
        transcendentals=0,
        bytes_accessed=B * rows * L * itemsize + B * ns * out_rows * L * 4)

    partial = pl.pallas_call(
        kernel,
        out_shape=jax.ShapeDtypeStruct((B, ns, out_rows, L), jnp.float32),
        grid_spec=pltpu.PrefetchScalarGridSpec(
            num_scalar_prefetch=0,
            grid=(B, ns, nt_per),
            in_specs=[pl.BlockSpec((1, t_rows, L), x_map)],
            out_specs=pl.BlockSpec((1, 1, out_rows, L), o_map),
        ),
        compiler_params=pltpu.CompilerParams(
            dimension_semantics=("parallel", "parallel", "arbitrary"),
            vmem_limit_bytes=32 * 1024 * 1024),
        cost_estimate=cost,
    )(x_in)

    # ---- tiny XLA epilogue on (B, <=128) data ----
    lane_sums = jnp.sum(partial, axis=(1, 2))                       # (B, L)
    if packed:
        class_sums = jnp.sum(lane_sums.reshape(B, G, C), axis=1)    # (B, C)
    else:
        class_sums = lane_sums                                      # L == C
    p = class_sums / T + 1e-10           # == mean over T of (x + 1e-10)
    lab = label.astype(jnp.float32)
    lab = lab.at[:, 0].set(T - lab[:, 0]) / T
    return -jnp.sum(jnp.log(p) * lab) / B


def ace_loss_ref(x, label):
    """Pure-JAX reference mirroring the PyTorch forward."""
    B, H, W, C = x.shape
    T = H * W
    x3 = x.reshape(B, T, C).astype(jnp.float32) + 1e-10
    lab = label.astype(jnp.float32)
    lab = lab.at[:, 0].set(T - lab[:, 0])
    p = jnp.sum(x3, axis=1) / T
    lab = lab / T
    return -jnp.sum(jnp.log(p) * lab) / B


def _make_case(key, B, H, W, C):
    k1, k2 = jax.random.split(key)
    logits = jax.random.normal(k1, (B, H, W, C), dtype=jnp.float32)
    x = jax.nn.softmax(logits, axis=-1)
    counts = jax.random.randint(k2, (B, C), 0, 3).astype(jnp.float32)
    label = counts.at[:, 0].set(0.0)
    return x, label


if __name__ == "__main__":
    key = jax.random.PRNGKey(0)
    keys = jax.random.split(key, 4)
    ace_jit = jax.jit(ace_loss, static_argnames=("target_block_bytes",))

    # Case 1: packed lane-dense path, single tile (C=32 divides 128, T=16).
    x1, l1 = _make_case(keys[0], 2, 4, 4, 32)
    out1 = ace_jit(x1, l1)
    jax.block_until_ready(out1)
    assert jnp.allclose(out1, ace_loss_ref(x1, l1), rtol=1e-5, atol=1e-5), out1

    # Case 2: natural path, single tile with rows not a multiple of 8
    # (C=48 does not divide 128, T=25).
    x2, l2 = _make_case(keys[1], 2, 5, 5, 48)
    out2 = ace_jit(x2, l2)
    jax.block_until_ready(out2)
    assert jnp.allclose(out2, ace_loss_ref(x2, l2), rtol=1e-5, atol=1e-5), out2

    # Case 3: packed path, forced small tiles -> multi-tile, masked tail row
    # tile, and the v7x-style 2-way row-reduction split (B=1, odd).
    x3, l3 = _make_case(keys[2], 1, 33, 50, 64)
    out3 = ace_jit(x3, l3, target_block_bytes=256 * 1024)
    jax.block_until_ready(out3)
    assert jnp.allclose(out3, ace_loss_ref(x3, l3), rtol=1e-5, atol=1e-5), out3

    # Case 4: natural path with C > 128 (no 128-divisibility), forced small
    # tiles -> multi-tile with masked tail.
    x4, l4 = _make_case(keys[3], 2, 10, 10, 200)
    out4 = ace_jit(x4, l4, target_block_bytes=32 * 1024)
    jax.block_until_ready(out4)
    assert jnp.allclose(out4, ace_loss_ref(x4, l4), rtol=1e-5, atol=1e-5), out4

    print("KERNEL_OK")
</pallas_src>

<mosaic_0001>
module attributes {stable_mosaic.version = 11 : i64} {
  func.func @kernel(%arg0: i32, %arg1: i32, %arg2: i32, %arg3: memref<1x4x128xf32, #tpu.memory_space<vmem>>, %arg4: memref<1x1x1x128xf32, #tpu.memory_space<vmem>>) attributes {dimension_semantics = [#tpu.dimension_semantics<parallel>, #tpu.dimension_semantics<parallel>, #tpu.dimension_semantics<arbitrary>], iteration_bounds = array<i64: 2, 1, 1>, scalar_prefetch = 0 : i64, scratch_operands = 0 : i64, tpu.core_type = #tpu.core_type<tc>, window_params = [{transform_indices = @transform_0, window_bounds = array<i64: 1, 4, 128>}, {transform_indices = @transform_1, window_bounds = array<i64: 1, 1, 1, 128>}]} {
    %c0 = arith.constant 0 : index
    %c0_0 = arith.constant 0 : index
    %c0_1 = arith.constant 0 : index
    %0 = vector.load %arg3[%c0, %c0_0, %c0_1] : memref<1x4x128xf32, #tpu.memory_space<vmem>>, vector<1x4x128xf32>
    %1 = vector.shape_cast %0 : vector<1x4x128xf32> to vector<4x128xf32>
    %cst = arith.constant dense<0.000000e+00> : vector<128xf32>
    %2 = vector.multi_reduction <add>, %1, %cst [0] : vector<4x128xf32> to vector<128xf32>
    %3 = vector.shape_cast %2 : vector<128xf32> to vector<1x128xf32>
    %c0_2 = arith.constant 0 : index
    %c0_3 = arith.constant 0 : index
    %c0_4 = arith.constant 0 : index
    %c0_5 = arith.constant 0 : index
    %4 = vector.load %arg4[%c0_2, %c0_3, %c0_4, %c0_5] : memref<1x1x1x128xf32, #tpu.memory_space<vmem>>, vector<1x1x1x128xf32>
    %5 = vector.shape_cast %4 : vector<1x1x1x128xf32> to vector<1x128xf32>
    %6 = vector.shape_cast %3 : vector<1x128xf32> to vector<1x1x1x128xf32>
    tpu.vector_store %arg4[%c0_2, %c0_3, %c0_4, %c0_5], %6 {strides = array<i32>} : memref<1x1x1x128xf32, #tpu.memory_space<vmem>>, vector<1x1x1x128xf32>,
    return
  }
  func.func @transform_0(%arg0: i32, %arg1: i32, %arg2: i32) -> (i32, i32, i32) {
    %c1_i32 = arith.constant 1 : i32
    %0 = arith.muli %arg1, %c1_i32 : i32
    %1 = arith.addi %0, %arg2 : i32
    %c0_i32 = arith.constant 0 : i32
    %2 = arith.minsi %1, %c0_i32 : i32
    %c0_i32_0 = arith.constant 0 : i32
    %c0_i32_1 = arith.constant 0 : i32
    return %arg0, %2, %c0_i32_0 : i32, i32, i32
  }
  func.func @transform_1(%arg0: i32, %arg1: i32, %arg2: i32) -> (i32, i32, i32, i32) {
    %c0_i32 = arith.constant 0 : i32
    %c0_i32_0 = arith.constant 0 : i32
    %c0_i32_1 = arith.constant 0 : i32
    return %arg0, %arg1, %c0_i32, %c0_i32_0 : i32, i32, i32, i32
  }
}

</mosaic_0001>

<bundles_post_ra>
// kernel: ace_loss.1
= control target key start
LH: loop header
LB: loop body
LE: loop exit
PB: predicated region body
PF: predicated region fallthrough
CT: control target
= control target key end

     0   :  { %s316_s6 = smov 0   ;;  %s318_s7 = smov 0   ;;  %s337_s0 = inlined_call_operand.vmem [shape: f32[2,4,128], index: 0, kind: input, shape index: {}]   ;;  %s338_s1 = inlined_call_operand.vmem [shape: f32[2,1,1,128], index: 1, kind: output, shape index: {}]  }
   0x1   :  { %s320_s8 = smov 0  }
   0x2 LB: > { %s30_s9 = sadd.s32 1, %s300_s7  ;;  %p254_p0 = scmp.ge.s32.totalorder %s304_s8, 1  ;;  %s304_s8 = sphi %s320_s8, %s11_s8   ;;  %s300_s7 = sphi %s318_s7, %s340_s7   ;;  %s296_s6 = sphi %s316_s6, %s339_s6  }
   0x3   : > { %p32_p1 = scmp.ge.s32.totalorder %s30_s9, 2  ;;  %p124_p2 = scmp.lt.s32.totalorder %s304_s8, 3 }
   0x5   : > { %s342_s9 = smov (%p32_p1, %s30_s9), 0  ;;  %p125_p3 = pnand %p254_p0, %p124_p2 }
   0x6   : > { %p153_p4 = scmp.lt.s32.totalorder (!%p125_p3), %s296_s6, 1  ;;  %vm170_vm0 = vcmask (!%p125_p3), 1043456  }
   0x7   : > { %128 = sbr.rel (%p125_p3) target bundleno = 32 (0x20), region = 24 }
   0xe   : > { %s344_s6 = smov (!%p153_p4, %s296_s6), 1 }
   0xf   : > { %s255_s10 = sshll.u32 %s344_s6, 2  ;;  %s168_s16 = scalar_lea.vmem %s338_s1, %s344_s6 }
  0x10   : > { %s159_s13 = scalar_lea.vmem %s337_s0, %s255_s10 }
  0x11   : > { %v169_v0 = vld [vmem:[%s159_s13] sm:$0xf] }
  0x12   : > { %v171_v1 = vsel %vm170_vm0, %v169_v0, 0.0 }
  0x13   : > { %v172_v2 = vrot.slane %v171_v1, 4 }
  0x15   : > { %v173_v3 = vadd.f32 %v172_v2, %v171_v1 }
  0x17   : > { %v174_v4 = vrot.slane %v173_v3, 2 }
  0x19   : > { %v175_v5 = vadd.f32 %v174_v4, %v173_v3 }
  0x1b   : > { %v176_v6 = vrot.slane %v175_v5, 1 }
  0x1d   : > { %v177_v7 = vadd.f32 %v176_v6, %v175_v5 }
  0x1f   : > { %178 = vst [vmem:[%s168_s16] sm:$0x1] %v177_v7 }
  0x20 PF: > { %s11_s8 = sadd.s32 1, %s304_s8   ;;  %s339_s6 = smov %s300_s7 }
  0x21   : > { %p8_p5 = scmp.ge.s32.totalorder %s11_s8, 4   ;;  %s340_s7 = smov %s342_s9 }
  0x23   :  { %10 = sbr.rel (!%p8_p5) target bundleno = 2 (0x2), region = 54 }

</bundles_post_ra>
